<compile_context>
chip_gen: v6e
topology: v6e:2x2x1
jax: 0.10.0
libtpu: 0.0.40
codegen_flags: <defaults>
</compile_context>

<pallas_src>
import functools

import jax
import jax.numpy as jnp
from jax import lax
from jax.experimental import pallas as pl
from jax.experimental.pallas import tpu as pltpu


def _round_up(x, m):
    return ((x + m - 1) // m) * m


def _dense_fc_kernel_single_k(x_ref, w_ref, b_ref, o_ref):
    """Whole K in one tile: y_tile = x_tile @ w_tile.T + b_tile (no scratch)."""
    acc = lax.dot_general(
        x_ref[...],
        w_ref[...],
        dimension_numbers=(((1,), (1,)), ((), ())),  # contract on K of both
        preferred_element_type=jnp.float32,
    )
    o_ref[...] = (acc + b_ref[...].astype(jnp.float32)).astype(o_ref.dtype)


def _dense_fc_kernel_multi_k(x_ref, w_ref, b_ref, o_ref, acc_ref):
    """One (tm, tn) output tile, accumulating over the K grid axis.

    x_ref:   (tm, tk)  activation tile
    w_ref:   (tn, tk)  weight tile, native PyTorch [out, in] layout
    b_ref:   (1, tn)   bias tile (f32)
    o_ref:   (tm, tn)  output tile
    acc_ref: (tm, tn)  f32 VMEM accumulator, resident across the K axis
    """
    k = pl.program_id(2)

    @pl.when(k == 0)
    def _init():
        acc_ref[...] = jnp.zeros_like(acc_ref)

    acc_ref[...] += lax.dot_general(
        x_ref[...],
        w_ref[...],
        dimension_numbers=(((1,), (1,)), ((), ())),
        preferred_element_type=jnp.float32,
    )

    @pl.when(k == pl.num_programs(2) - 1)
    def _finalize():
        out = acc_ref[...] + b_ref[...].astype(jnp.float32)
        o_ref[...] = out.astype(o_ref.dtype)


@functools.partial(jax.jit, static_argnames=("tm", "tn", "tk", "compute_dtype"))
def dense_fc(x, weight, bias, *, tm=256, tn=256, tk=512, compute_dtype=None):
    """y = x @ weight.T + bias  (PyTorch nn.Linear forward).

    x:      [M, K] float32
    weight: [N, K] float32 (native PyTorch layout)
    bias:   [N]    float32
    compute_dtype: optional MXU operand dtype (e.g. jnp.bfloat16); accumulation
                   and bias add are always f32, output keeps x.dtype.
    """
    M, K = x.shape
    N, K2 = weight.shape
    assert K == K2, "weight inner dim must match x feature dim"
    assert bias.shape == (N,), "bias must be [output_dim]"

    out_dtype = x.dtype
    if compute_dtype is None:
        compute_dtype = x.dtype

    # Lane/sublane-aligned padded problem sizes.
    mp = _round_up(M, 8)      # sublanes
    np_ = _round_up(N, 128)   # lanes (lane-dense output)
    kp = _round_up(K, 128)    # lanes for x / w tiles

    # Clamp tiles to the padded problem, then re-round so the grid divides evenly.
    tm = min(tm, mp)
    tn = min(tn, np_)
    tk = min(tk, kp)
    mp = _round_up(mp, tm)
    np_ = _round_up(np_, tn)
    kp = _round_up(kp, tk)

    xc = x.astype(compute_dtype)
    wc = weight.astype(compute_dtype)
    bc = bias.astype(jnp.float32)

    if (mp, kp) != (M, K):
        xc = jnp.pad(xc, ((0, mp - M), (0, kp - K)))
    if (np_, kp) != (N, K):
        wc = jnp.pad(wc, ((0, np_ - N), (0, kp - K)))
    if np_ != N:
        bc = jnp.pad(bc, (0, np_ - N))
    b2d = bc.reshape(1, np_)

    in_bytes = jnp.dtype(compute_dtype).itemsize
    out_bytes = jnp.dtype(out_dtype).itemsize

    # Explicit VMEM budget: double-buffered x/w/bias tiles + output + f32 acc,
    # with 2x headroom, kept safely under v7x's 64 MiB physical VMEM.
    vmem_bytes = (2 * (tm * tk + tn * tk + tn) * in_bytes
                  + 2 * tm * tn * out_bytes
                  + tm * tn * 4)
    vmem_limit = int(min(max(2 * vmem_bytes, 16 * 1024 * 1024), 48 * 1024 * 1024))

    cost = pl.CostEstimate(
        flops=2 * mp * np_ * kp,
        transcendentals=0,
        bytes_accessed=(mp * kp + np_ * kp) * in_bytes
        + np_ * 4
        + mp * np_ * out_bytes,
    )

    single_k = kp == tk  # whole reduction fits one tile -> no accumulator needed

    if single_k:
        grid = (mp // tm, np_ // tn)
        out_padded = pl.pallas_call(
            _dense_fc_kernel_single_k,
            out_shape=jax.ShapeDtypeStruct((mp, np_), out_dtype),
            grid_spec=pltpu.PrefetchScalarGridSpec(
                num_scalar_prefetch=0,
                grid=grid,
                in_specs=[
                    pl.BlockSpec((tm, tk), lambda i, j: (i, 0)),   # x tile
                    pl.BlockSpec((tn, tk), lambda i, j: (j, 0)),   # W tile (native [N, K])
                    pl.BlockSpec((1, tn), lambda i, j: (0, j)),    # bias tile
                ],
                out_specs=pl.BlockSpec((tm, tn), lambda i, j: (i, j)),
            ),
            compiler_params=pltpu.CompilerParams(
                dimension_semantics=("parallel", "parallel"),
                vmem_limit_bytes=vmem_limit,
            ),
            cost_estimate=cost,
        )(xc, wc, b2d)
    else:
        grid = (mp // tm, np_ // tn, kp // tk)
        out_padded = pl.pallas_call(
            _dense_fc_kernel_multi_k,
            out_shape=jax.ShapeDtypeStruct((mp, np_), out_dtype),
            grid_spec=pltpu.PrefetchScalarGridSpec(
                num_scalar_prefetch=0,
                grid=grid,
                in_specs=[
                    pl.BlockSpec((tm, tk), lambda i, j, k: (i, k)),   # x tile
                    pl.BlockSpec((tn, tk), lambda i, j, k: (j, k)),   # W tile (native [N, K])
                    pl.BlockSpec((1, tn), lambda i, j, k: (0, j)),    # bias tile
                ],
                out_specs=pl.BlockSpec((tm, tn), lambda i, j, k: (i, j)),
                scratch_shapes=[pltpu.VMEM((tm, tn), jnp.float32)],
            ),
            compiler_params=pltpu.CompilerParams(
                dimension_semantics=("parallel", "parallel", "arbitrary"),
                vmem_limit_bytes=vmem_limit,
            ),
            cost_estimate=cost,
        )(xc, wc, b2d)

    if (mp, np_) != (M, N):
        out_padded = out_padded[:M, :N]
    return out_padded


if __name__ == "__main__":
    # DenseFC(input_dim=32, output_dim=16, reg=0.0); `reg` is unused in forward.
    input_dim = 32
    output_dim = 16
    batch = 8

    key = jax.random.PRNGKey(0)
    kx, kw, kb = jax.random.split(key, 3)

    # Deterministic init mimicking nn.Linear's uniform(-1/sqrt(in), 1/sqrt(in)).
    bound = 1.0 / jnp.sqrt(jnp.float32(input_dim))
    x = jax.random.normal(kx, (batch, input_dim), dtype=jnp.float32)
    weight = jax.random.uniform(kw, (output_dim, input_dim), jnp.float32, -bound, bound)
    bias = jax.random.uniform(kb, (output_dim,), jnp.float32, -bound, bound)

    y_ref = x @ weight.T + bias

    # f32 path (single-K fast path at this size): matches the reference closely.
    y = dense_fc(x, weight, bias)
    jax.block_until_ready(y)
    assert y.shape == (batch, output_dim)
    assert jnp.allclose(y, y_ref, atol=1e-5, rtol=1e-5)

    # bf16 MXU-operand fast path (f32 accumulation), looser tolerance.
    y_bf16 = dense_fc(x, weight, bias, compute_dtype=jnp.bfloat16)
    jax.block_until_ready(y_bf16)
    assert y_bf16.shape == (batch, output_dim)
    assert jnp.allclose(y_bf16, y_ref, atol=5e-2, rtol=5e-2)

    # Exercise the multi-K accumulator path (K split across the grid) to make
    # sure both kernel variants run on-device.
    K_big, N_big, M_big = 512, 256, 64
    kx2, kw2, kb2 = jax.random.split(jax.random.PRNGKey(1), 3)
    x2 = jax.random.normal(kx2, (M_big, K_big), dtype=jnp.float32)
    w2 = jax.random.normal(kw2, (N_big, K_big), dtype=jnp.float32) * 0.05
    b2 = jax.random.normal(kb2, (N_big,), dtype=jnp.float32)
    y2 = dense_fc(x2, w2, b2, tk=128)
    jax.block_until_ready(y2)
    assert jnp.allclose(y2, x2 @ w2.T + b2, atol=1e-3, rtol=1e-3)

    print("KERNEL_OK")
</pallas_src>

<mosaic_0001>
module attributes {stable_mosaic.version = 11 : i64} {
  func.func @_dense_fc_kernel_single_k(%arg0: i32, %arg1: i32, %arg2: memref<8x128xf32, #tpu.memory_space<vmem>>, %arg3: memref<128x128xf32, #tpu.memory_space<vmem>>, %arg4: memref<1x128xf32, #tpu.memory_space<vmem>>, %arg5: memref<8x128xf32, #tpu.memory_space<vmem>>) attributes {dimension_semantics = [#tpu.dimension_semantics<parallel>, #tpu.dimension_semantics<parallel>], iteration_bounds = array<i64: 1, 1>, scalar_prefetch = 0 : i64, scratch_operands = 0 : i64, tpu.core_type = #tpu.core_type<tc>, window_params = [{transform_indices = @transform_0, window_bounds = array<i64: 8, 128>}, {transform_indices = @transform_1, window_bounds = array<i64: 128, 128>}, {transform_indices = @transform_2, window_bounds = array<i64: 1, 128>}, {transform_indices = @transform_3, window_bounds = array<i64: 8, 128>}]} {
    %c0 = arith.constant 0 : index
    %c0_0 = arith.constant 0 : index
    %0 = vector.load %arg2[%c0, %c0_0] : memref<8x128xf32, #tpu.memory_space<vmem>>, vector<8x128xf32>
    %c0_1 = arith.constant 0 : index
    %c0_2 = arith.constant 0 : index
    %1 = vector.load %arg3[%c0_1, %c0_2] : memref<128x128xf32, #tpu.memory_space<vmem>>, vector<128x128xf32>
    %cst = arith.constant dense<0.000000e+00> : vector<8x128xf32>
    %2 = tpu.matmul %0, %1, %cst {dimension_numbers = #tpu.dot_dimension_numbers<[1], [1], [0], [0], [0, 0, 1, 0], [], []>} : vector<8x128xf32>, vector<128x128xf32>, vector<8x128xf32> -> vector<8x128xf32>
    %c0_3 = arith.constant 0 : index
    %c0_4 = arith.constant 0 : index
    %3 = vector.load %arg4[%c0_3, %c0_4] : memref<1x128xf32, #tpu.memory_space<vmem>>, vector<1x128xf32>
    %4 = vector.broadcast %3 : vector<1x128xf32> to vector<8x128xf32>
    %5 = arith.addf %2, %4 : vector<8x128xf32>
    %c0_5 = arith.constant 0 : index
    %c0_6 = arith.constant 0 : index
    %6 = vector.load %arg5[%c0_5, %c0_6] : memref<8x128xf32, #tpu.memory_space<vmem>>, vector<8x128xf32>
    tpu.vector_store %arg5[%c0_5, %c0_6], %5 {strides = array<i32>} : memref<8x128xf32, #tpu.memory_space<vmem>>, vector<8x128xf32>,
    return
  }
  func.func @transform_0(%arg0: i32, %arg1: i32) -> (i32, i32) {
    %c0_i32 = arith.constant 0 : i32
    %c0_i32_0 = arith.constant 0 : i32
    return %arg0, %c0_i32 : i32, i32
  }
  func.func @transform_1(%arg0: i32, %arg1: i32) -> (i32, i32) {
    %c0_i32 = arith.constant 0 : i32
    %c0_i32_0 = arith.constant 0 : i32
    return %arg1, %c0_i32 : i32, i32
  }
  func.func @transform_2(%arg0: i32, %arg1: i32) -> (i32, i32) {
    %c0_i32 = arith.constant 0 : i32
    %c0_i32_0 = arith.constant 0 : i32
    return %c0_i32, %arg1 : i32, i32
  }
  func.func @transform_3(%arg0: i32, %arg1: i32) -> (i32, i32) {
    %c0_i32 = arith.constant 0 : i32
    return %arg0, %arg1 : i32, i32
  }
}

</mosaic_0001>

<bundles_post_ra>
// kernel: dense_fc.1
= control target key start
LH: loop header
LB: loop body
LE: loop exit
PB: predicated region body
PF: predicated region fallthrough
CT: control target
= control target key end

     0   :  { %v202_v1 = vmov 0.0   ;;  %vm203_vm0 = vmmov 0   ;;  %s282_s0 = inlined_call_operand.vmem [shape: f32[8,128], index: 0, kind: input, shape index: {}]   ;;  %s283_s1 = inlined_call_operand.vmem [shape: f32[128,128], index: 1, kind: input, shape index: {}]   ;;  %s284_s2 = inlined_call_operand.vmem [shape: f32[1,128], index: 2, kind: input, shape index: {}]   ;;  %s285_s3 = inlined_call_operand.hbm [shape: f32[8,128], index: 3, kind: output, shape index: {}]  }
   0x1   :  { %v31_v0 = vld [vmem:[%s283_s1 + $0x78] sm:$0xff]  ;;  %142 = vmatprep.subr.mxu0 %v202_v1  ;;  %174 = vmatprep.mubr.msk.f32.mxu0 %vm203_vm0, %v202_v1  ;;  %v30_v2 = vld [vmem:[%s283_s1 + $0x70] sm:$0xff] }
   0x2   :  { %143 = vmatpush3.xpose.msra.mxu0 %v31_v0 }
   0x3   :  { %144 = vmatprep.subr.mxu0 %v202_v1 }
   0x6   :  { %145 = vmatpush3.xpose.msra.mxu0 %v30_v2 }
   0x7   :  { %8 = vsyncpa [#allocation3], 0  ;;  %146 = vmatprep.subr.mxu0 %v202_v1  ;;  %v29_v3 = vld [vmem:[%s283_s1 + $0x68] sm:$0xff]  ;;  %v28_v4 = vld [vmem:[%s283_s1 + $0x60] sm:$0xff]  ;;  %s204_s21 = smov [#allocation2]  }
   0x8   :  { %v27_v5 = vld [vmem:[%s283_s1 + $0x58] sm:$0xff]  ;;  %v26_v6 = vld [vmem:[%s283_s1 + $0x50] sm:$0xff]  ;;  %v25_v7 = vld [vmem:[%s283_s1 + $0x48] sm:$0xff]  ;;  %s116_s22 = sshll.u32 %s204_s21, 4  ;;  %s117_s22 = int_to_ptr.vmem [resolvable:$true] %s116_s22 }
   0x9   :  { %v24_v8 = vld [vmem:[%s283_s1 + $0x40] sm:$0xff]  ;;  %v23_v9 = vld [vmem:[%s283_s1 + $0x38] sm:$0xff]  ;;  %v22_v10 = vld [vmem:[%s283_s1 + $0x30] sm:$0xff]  ;;  %s180_s23 = scalar_lea.vmem %s117_s22, 128  ;;  %p185_p1 = scmp.lt.s32.totalorder %s117_s22, %s117_s22 }
   0xa   :  { %147 = vmatpush3.xpose.msra.mxu0 %v29_v3  ;;  %v21_v11 = vld [vmem:[%s283_s1 + $0x28] sm:$0xff]  ;;  %v20_v12 = vld [vmem:[%s283_s1 + $0x20] sm:$0xff]  ;;  %v19_v13 = vld [vmem:[%s283_s1 + $0x18] sm:$0xff]  ;;  %p181_p0 = scmp.ne.s32.totalorder %s117_s22, %s180_s23  ;;  %p186_p2 = scmp.lt.s32.totalorder %s180_s23, %s180_s23 }
   0xb   :  { %148 = vmatprep.subr.mxu0 %v202_v1  ;;  %v18_v14 = vld [vmem:[%s283_s1 + $0x10] sm:$0xff]  ;;  %v17_v15 = vld [vmem:[%s283_s1 + $0x8] sm:$0xff]  ;;  %v16_v16 = vld [vmem:[%s283_s1] sm:$0xff] }
   0xc   :  { %v15_v17 = vld [vmem:[%s282_s0] sm:$0xff]  ;;  %p187_p3 = por %p186_p2, %p185_p1 }
   0xd   :  { %v124_v18 = vld [vmem:[%s284_s2] ss:$0 sm:$0xff] }
   0xe   :  { %149 = vmatpush3.xpose.msra.mxu0 %v28_v4  ;;  %p188_p4 = pnand %p187_p3, %p181_p0 }
   0xf   :  { %150 = vmatprep.subr.mxu0 %v202_v1 }
  0x12   :  { %151 = vmatpush3.xpose.msra.mxu0 %v27_v5 }
  0x13   :  { %152 = vmatprep.subr.mxu0 %v202_v1 }
  0x16   :  { %153 = vmatpush3.xpose.msra.mxu0 %v26_v6 }
  0x17   :  { %154 = vmatprep.subr.mxu0 %v202_v1 }
  0x1a   :  { %155 = vmatpush3.xpose.msra.mxu0 %v25_v7 }
  0x1b   :  { %156 = vmatprep.subr.mxu0 %v202_v1 }
  0x1e   :  { %157 = vmatpush3.xpose.msra.mxu0 %v24_v8 }
  0x1f   :  { %158 = vmatprep.subr.mxu0 %v202_v1 }
  0x22   :  { %159 = vmatpush3.xpose.msra.mxu0 %v23_v9 }
  0x23   :  { %160 = vmatprep.subr.mxu0 %v202_v1 }
  0x26   :  { %161 = vmatpush3.xpose.msra.mxu0 %v22_v10 }
  0x27   :  { %162 = vmatprep.subr.mxu0 %v202_v1 }
  0x2a   :  { %163 = vmatpush3.xpose.msra.mxu0 %v21_v11 }
  0x2b   :  { %164 = vmatprep.subr.mxu0 %v202_v1 }
  0x2e   :  { %165 = vmatpush3.xpose.msra.mxu0 %v20_v12 }
  0x2f   :  { %166 = vmatprep.subr.mxu0 %v202_v1 }
  0x32   :  { %167 = vmatpush3.xpose.msra.mxu0 %v19_v13 }
  0x33   :  { %168 = vmatprep.subr.mxu0 %v202_v1 }
  0x36   :  { %169 = vmatpush3.xpose.msra.mxu0 %v18_v14 }
  0x37   :  { %170 = vmatprep.subr.mxu0 %v202_v1 }
  0x3a   :  { %171 = vmatpush3.xpose.msra.mxu0 %v17_v15 }
  0x3b   :  { %172 = vmatprep.subr.mxu0 %v202_v1 }
  0x3e   :  { %173 = vmatpush3.xpose.msra.mxu0 %v16_v16 }
  0x41   :  { %175 = vmatmul.mubr.f32.vlgmr.msra.gmra.mxu0 %v15_v17 }
 0x101   :  { %v105_v19 = vpop.f32.mrf.mxu0 }
 0x102   :  { %v106_v20 = vadd.f32 %v124_v18, %v105_v19 }
 0x103   :  { %v176_v21 = vpop.f32.mrf.mxu0 }
 0x104   :  { %109 = vst [vmem:[#allocation2] sm:$0xff] %v106_v20 }
 0x105   :  { %191 = shalt.err (!%p188_p4)
}
 0x106   :  { %119 = dma.vmem_to_hbm [thread:$0]  %s117_s22, 128, %s285_s3, [#allocation3]  }
 0x107   :  { %200 = dma.done.wait [#allocation3], 128  }
 0x108   :  { %201 = vsyncadd [#allocation3], 4294967168 }
 0x109   :  { %123 = vsyncpa [#allocation3], 1 }

</bundles_post_ra>
